<compile_context>
chip_gen: v6e
topology: v6e:2x2x1
jax: 0.10.0
libtpu: 0.0.40
codegen_flags: <defaults>
</compile_context>

<pallas_src>
import functools

import jax
import jax.numpy as jnp
from jax import lax
from jax.experimental import pallas as pl
from jax.experimental.pallas import tpu as pltpu


def _round_up(v, m):
    return (v + m - 1) // m * m


_VMEM_BUDGET = 36 * 1024 * 1024   # per-step working-set target (safe under v7x 64 MiB)
_VMEM_LIMIT = 64 * 1024 * 1024    # scoped limit: >= default on all gens, <= physical
_ROW_TILE_CAP = 512               # >=512 reaches ~85% of HBM roofline on v5e/v6e


def _pick_row_tile(ohw, kpad, cpad, cout8):
    """Largest multiple-of-128 row tile <= cap whose pipelined working set fits."""
    tm = max(128, min(_ROW_TILE_CAP, _round_up(ohw, 128)))

    def vmem_bytes(t):
        return (2 * t * kpad * 2        # patches tile, bf16, double-buffered
                + 2 * kpad * cpad * 2   # weights, bf16, double-buffered (constant index)
                + 2 * cout8 * t * 4     # output tile, f32, double-buffered
                + 2 * t * cpad * 4      # f32 conv value + transpose temporary
                + 4 * cpad * 4)         # partial-stats / mean+scale tiles

    while tm > 128 and vmem_bytes(tm) > _VMEM_BUDGET:
        tm -= 128
    return tm


def _conv_stats_kernel(p_ref, w_ref, stats_ref):
    """Per-tile conv matmul + per-channel partial sums (no resident accumulator).

    p_ref:     (tm, Kpad)   bf16 im2col patch tile
    w_ref:     (Kpad, Cpad) bf16 packed weights
    stats_ref: (2, Cpad)    f32 partial stats for THIS tile (row0=sum, row1=sumsq)
    """
    conv = jnp.dot(p_ref[...], w_ref[...], preferred_element_type=jnp.float32)
    stats_ref[0:1, :] = jnp.sum(conv, axis=0, keepdims=True)
    stats_ref[1:2, :] = jnp.sum(conv * conv, axis=0, keepdims=True)


def _conv_bn_relu_kernel(p_ref, w_ref, ms_ref, o_ref, *, cout8):
    """Recompute conv for this tile, normalize with global stats, ReLU, and
    store the tile transposed (channels-major) so NCHW is a free reshape.

    p_ref:  (tm, Kpad)   bf16
    w_ref:  (Kpad, Cpad) bf16
    ms_ref: (2, Cpad)    f32: row0 = mean, row1 = rsqrt(var + eps)
    o_ref:  (cout8, tm)  f32: real output channels x rows (lane-dense in tm)
    """
    conv = jnp.dot(p_ref[...], w_ref[...], preferred_element_type=jnp.float32)
    mean = ms_ref[0:1, :]
    scale = ms_ref[1:2, :]
    y = jnp.maximum((conv - mean) * scale, 0.0)       # (tm, Cpad)
    # Full (tm, Cpad) -> (Cpad, tm) XLU transpose, then keep the real channels.
    o_ref[...] = y.T[:cout8, :]


def conv_block_forward(x_nchw, weight, bias=None, *, stride=1, padding=0,
                       dilation=1, eps=1e-5):
    """Conv2d -> BatchNorm2d(affine=False, batch stats) -> ReLU.

    x_nchw: (N, Cin, H, W); weight: (Cout, Cin, KH, KW); bias: (Cout,) or None.
    `bias` is accepted for API parity but unused: under training-mode
    BatchNorm(affine=False) a per-channel constant is cancelled by the mean
    subtraction.  Returns (N, Cout, OH, OW) float32.
    """
    del bias  # mathematically a no-op before BatchNorm(affine=False, batch stats)

    N, Cin, H, W = x_nchw.shape
    Cout, _, KH, KW = weight.shape
    OH = (H + 2 * padding - dilation * (KH - 1) - 1) // stride + 1
    OW = (W + 2 * padding - dilation * (KW - 1) - 1) // stride + 1
    OHW = OH * OW
    M = N * OHW                          # true number of conv output rows
    K = KH * KW * Cin

    Kpad = _round_up(K, 128)             # lane-dense contraction for the MXU
    Cpad = _round_up(Cout, 128)          # lane-dense matmul output
    cout8 = _round_up(Cout, 8)           # sublane-dense transposed store

    tm = _pick_row_tile(OHW, Kpad, Cpad, cout8)
    OHW_pad = _round_up(OHW, tm)
    T = OHW_pad // tm                    # row tiles per image

    # ---- wrapper glue: im2col packing in bf16 (stride/dilation handled here) --
    # TODO(synk): pack patches on-chip (overlapping row tiles or a (kh,kw) grid
    # axis accumulating into VMEM) to remove the KH*KW-duplicated HBM slab; kept
    # in the wrapper here to stay general over stride/dilation.
    x_nhwc = jnp.transpose(x_nchw, (0, 2, 3, 1)).astype(jnp.bfloat16)
    x_pad = jnp.pad(x_nhwc,
                    ((0, 0), (padding, padding), (padding, padding), (0, 0)))
    windows = []
    for kh in range(KH):
        for kw in range(KW):
            h0, w0 = kh * dilation, kw * dilation
            windows.append(lax.slice(
                x_pad,
                (0, h0, w0, 0),
                (N, h0 + (OH - 1) * stride + 1, w0 + (OW - 1) * stride + 1, Cin),
                (1, stride, stride, 1)))
    patches = jnp.concatenate(windows, axis=-1).reshape(N, OHW, K)
    patches = jnp.pad(patches, ((0, 0), (0, OHW_pad - OHW), (0, Kpad - K)))

    w_packed = jnp.transpose(weight, (2, 3, 1, 0)).reshape(K, Cout)
    w_packed = jnp.pad(w_packed, ((0, Kpad - K), (0, Cpad - Cout)))
    w_packed = w_packed.astype(jnp.bfloat16)

    cparams = pltpu.CompilerParams(
        dimension_semantics=("parallel", "parallel"),
        vmem_limit_bytes=_VMEM_LIMIT)

    # ---- pass 1: per-tile conv + partial [sum; sumsq]; fully parallel ---------
    # NOTE: the weight spec has a constant index_map; for very large Cin*Cout it
    # could be single-buffered to free VMEM for a bigger row tile.
    partial_stats = pl.pallas_call(
        _conv_stats_kernel,
        out_shape=jax.ShapeDtypeStruct((N, T, 2, Cpad), jnp.float32),
        grid=(N, T),
        in_specs=[pl.BlockSpec((None, tm, Kpad), lambda n, i: (n, i, 0)),
                  pl.BlockSpec((Kpad, Cpad), lambda n, i: (0, 0))],
        out_specs=pl.BlockSpec((None, None, 2, Cpad), lambda n, i: (n, i, 0, 0)),
        compiler_params=cparams,
    )(patches, w_packed)

    # Tiny cross-tile reduction + mean / rsqrt(var+eps): one XLA op on (2, Cpad).
    stats = jnp.sum(partial_stats, axis=(0, 1))              # (2, Cpad)
    inv_m = 1.0 / M                                          # true count (pad rows are zero)
    mean = stats[0] * inv_m
    # E[x^2]-E[x]^2 in f32; clamp the tiny negative cancellation residue.
    var = jnp.maximum(stats[1] * inv_m - mean * mean, 0.0)
    scale = lax.rsqrt(var + eps)
    mean_scale = jnp.stack([mean, scale]).astype(jnp.float32)  # (2, Cpad)

    # ---- pass 2: recompute conv, BN + ReLU, store channels-major --------------
    y = pl.pallas_call(
        functools.partial(_conv_bn_relu_kernel, cout8=cout8),
        out_shape=jax.ShapeDtypeStruct((N, cout8, OHW_pad), jnp.float32),
        grid=(N, T),
        in_specs=[pl.BlockSpec((None, tm, Kpad), lambda n, i: (n, i, 0)),
                  pl.BlockSpec((Kpad, Cpad), lambda n, i: (0, 0)),
                  pl.BlockSpec((2, Cpad), lambda n, i: (0, 0))],
        out_specs=pl.BlockSpec((None, cout8, tm), lambda n, i: (n, 0, i)),
        compiler_params=cparams,
    )(patches, w_packed, mean_scale)

    # Channels-major kernel output -> NCHW is (at most) a small slice + a free reshape.
    return y[:, :Cout, :OHW].reshape(N, Cout, OH, OW)


def _reference_forward(x_nchw, weight, bias, *, stride, padding, dilation,
                       eps=1e-5):
    """Pure-JAX reference (conv + bias + train-mode BN(affine=False) + ReLU)."""
    y = lax.conv_general_dilated(
        x_nchw.astype(jnp.float32), weight.astype(jnp.float32),
        window_strides=(stride, stride),
        padding=((padding, padding), (padding, padding)),
        rhs_dilation=(dilation, dilation),
        dimension_numbers=("NCHW", "OIHW", "NCHW"),
    ) + bias.reshape(1, -1, 1, 1)
    mean = jnp.mean(y, axis=(0, 2, 3), keepdims=True)
    var = jnp.mean((y - mean) ** 2, axis=(0, 2, 3), keepdims=True)
    return jnp.maximum((y - mean) * lax.rsqrt(var + eps), 0.0)


if __name__ == "__main__":
    # conv_block(filter_in=4, filter_out=8, kernel_size=3, stride=1, padding=1)
    N, Cin, H, W = 2, 4, 16, 16
    Cout, KH, KW = 8, 3, 3
    stride, padding, dilation = 1, 1, 1

    key = jax.random.PRNGKey(0)
    kx, kw, kb = jax.random.split(key, 3)
    x = jax.random.normal(kx, (N, Cin, H, W), dtype=jnp.float32)
    weight = jax.random.normal(kw, (Cout, Cin, KH, KW), dtype=jnp.float32) * 0.1
    bias = jax.random.normal(kb, (Cout,), dtype=jnp.float32) * 0.1

    out = conv_block_forward(x, weight, bias,
                             stride=stride, padding=padding, dilation=dilation)
    jax.block_until_ready(out)

    ref = _reference_forward(x, weight, bias,
                             stride=stride, padding=padding, dilation=dilation)
    assert out.shape == ref.shape == (N, Cout, H, W)
    # Patches/weights are fed to the MXU in bf16 (f32 accumulation), so allow a
    # slightly looser tolerance than pure-f32.
    assert jnp.allclose(out, ref, atol=3e-2, rtol=3e-2)

    print("KERNEL_OK")
</pallas_src>

<mosaic_0001>
module attributes {stable_mosaic.version = 11 : i64} {
  func.func @_conv_stats_kernel(%arg0: i32, %arg1: i32, %arg2: memref<1x256x128xbf16, #tpu.memory_space<vmem>>, %arg3: memref<128x128xbf16, #tpu.memory_space<vmem>>, %arg4: memref<1x1x2x128xf32, #tpu.memory_space<vmem>>) attributes {dimension_semantics = [#tpu.dimension_semantics<parallel>, #tpu.dimension_semantics<parallel>], iteration_bounds = array<i64: 2, 1>, scalar_prefetch = 0 : i64, scratch_operands = 0 : i64, tpu.core_type = #tpu.core_type<tc>, window_params = [{transform_indices = @transform_0, window_bounds = array<i64: 1, 256, 128>}, {pipeline_mode = #tpu.pipeline_mode<synchronous>, transform_indices = @transform_1, window_bounds = array<i64: 128, 128>}, {transform_indices = @transform_2, window_bounds = array<i64: 1, 1, 2, 128>}]} {
    %c0 = arith.constant 0 : index
    %c0_0 = arith.constant 0 : index
    %c0_1 = arith.constant 0 : index
    %0 = vector.load %arg2[%c0, %c0_0, %c0_1] : memref<1x256x128xbf16, #tpu.memory_space<vmem>>, vector<1x256x128xbf16>
    %1 = vector.shape_cast %0 : vector<1x256x128xbf16> to vector<256x128xbf16>
    %c0_2 = arith.constant 0 : index
    %c0_3 = arith.constant 0 : index
    %2 = vector.load %arg3[%c0_2, %c0_3] : memref<128x128xbf16, #tpu.memory_space<vmem>>, vector<128x128xbf16>
    %cst = arith.constant dense<0.000000e+00> : vector<256x128xf32>
    %3 = tpu.matmul %1, %2, %cst {dimension_numbers = #tpu.dot_dimension_numbers<[1], [0], [0], [1], [0, 0, 1, 1], [], []>} : vector<256x128xbf16>, vector<128x128xbf16>, vector<256x128xf32> -> vector<256x128xf32>
    %cst_4 = arith.constant dense<0.000000e+00> : vector<128xf32>
    %4 = vector.multi_reduction <add>, %3, %cst_4 [0] : vector<256x128xf32> to vector<128xf32>
    %5 = vector.shape_cast %4 : vector<128xf32> to vector<1x128xf32>
    %c0_5 = arith.constant 0 : index
    %c0_6 = arith.constant 0 : index
    %c0_7 = arith.constant 0 : index
    %c0_8 = arith.constant 0 : index
    %6 = vector.load %arg4[%c0_5, %c0_6, %c0_7, %c0_8] : memref<1x1x2x128xf32, #tpu.memory_space<vmem>>, vector<1x1x1x128xf32>
    %7 = vector.shape_cast %6 : vector<1x1x1x128xf32> to vector<1x128xf32>
    %8 = vector.shape_cast %5 : vector<1x128xf32> to vector<1x1x1x128xf32>
    tpu.vector_store %arg4[%c0_5, %c0_6, %c0_7, %c0_8], %8 {strides = array<i32>} : memref<1x1x2x128xf32, #tpu.memory_space<vmem>>, vector<1x1x1x128xf32>,
    %9 = arith.mulf %3, %3 : vector<256x128xf32>
    %cst_9 = arith.constant dense<0.000000e+00> : vector<128xf32>
    %10 = vector.multi_reduction <add>, %9, %cst_9 [0] : vector<256x128xf32> to vector<128xf32>
    %11 = vector.shape_cast %10 : vector<128xf32> to vector<1x128xf32>
    %c0_10 = arith.constant 0 : index
    %c0_11 = arith.constant 0 : index
    %c1 = arith.constant 1 : index
    %c0_12 = arith.constant 0 : index
    %12 = vector.load %arg4[%c0_10, %c0_11, %c1, %c0_12] : memref<1x1x2x128xf32, #tpu.memory_space<vmem>>, vector<1x1x1x128xf32>
    %13 = vector.shape_cast %12 : vector<1x1x1x128xf32> to vector<1x128xf32>
    %14 = vector.shape_cast %11 : vector<1x128xf32> to vector<1x1x1x128xf32>
    tpu.vector_store %arg4[%c0_10, %c0_11, %c1, %c0_12], %14 {strides = array<i32>} : memref<1x1x2x128xf32, #tpu.memory_space<vmem>>, vector<1x1x1x128xf32>,
    return
  }
  func.func @transform_0(%arg0: i32, %arg1: i32) -> (i32, i32, i32) {
    %c0_i32 = arith.constant 0 : i32
    %c0_i32_0 = arith.constant 0 : i32
    return %arg0, %arg1, %c0_i32 : i32, i32, i32
  }
  func.func @transform_1(%arg0: i32, %arg1: i32) -> (i32, i32) {
    %c0_i32 = arith.constant 0 : i32
    %c0_i32_0 = arith.constant 0 : i32
    %c0_i32_1 = arith.constant 0 : i32
    return %c0_i32, %c0_i32_0 : i32, i32
  }
  func.func @transform_2(%arg0: i32, %arg1: i32) -> (i32, i32, i32, i32) {
    %c0_i32 = arith.constant 0 : i32
    %c0_i32_0 = arith.constant 0 : i32
    %c0_i32_1 = arith.constant 0 : i32
    return %arg0, %arg1, %c0_i32, %c0_i32_0 : i32, i32, i32, i32
  }
}

</mosaic_0001>

<bundles_post_ra>
// kernel: tpu_custom_call.1
= control target key start
LH: loop header
LB: loop body
LE: loop exit
PB: predicated region body
PF: predicated region fallthrough
CT: control target
= control target key end

     0   :  { %7 = vsyncpa [#allocation3], 0  ;;  %s1365_s0 = inlined_call_operand.hbm [shape: bf16[2,256,128], index: 0, kind: input, shape index: {}]   ;;  %s1366_s1 = inlined_call_operand.hbm [shape: bf16[128,128], index: 1, kind: input, shape index: {}]   ;;  %s1367_s2 = inlined_call_operand.hbm [shape: f32[2,1,2,128], index: 2, kind: output, shape index: {}]  }
   0x1   :  { %9 = vsyncpa [#allocation3 + $0x1], 0 }
   0x2   :  { %10 = vsyncpa [#allocation6], 0 }
   0x3   :  { %11 = vsyncpa [#allocation4], 0 }
   0x4   :  { %13 = vsyncpa [#allocation4 + $0x1], 0  ;;  %s1153_s9 = smov 0   ;;  %s1155_s10 = smov 0  }
   0x5   :  { %s1157_s11 = smov 0   ;;  %s1159_s12 = smov 0  }
   0x6   :  { %s1161_s13 = smov 0   ;;  %s1163_s14 = smov 0  }
   0x7 LB: > { %s765_s15 = sadd.s32 4294967295, %s1131_s14   ;;  %s766_s16 = sadd.s32 4294967294, %s1131_s14   ;;  %s1131_s14 = sphi %s1163_s14, %s19_s14   ;;  %s1127_s13 = sphi %s1161_s13, %s1387_s13   ;;  %s1123_s12 = sphi %s1159_s12, %s1386_s12   ;;  %s1119_s11 = sphi %s1157_s11, %s1385_s11   ;;  %s1115_s10 = sphi %s1155_s10, %s1384_s10   ;;  %s1111_s9 = sphi %s1153_s9, %s1383_s9  }
   0x8   : > { %p53_p0 = scmp.ne.s32.totalorder %s1115_s10, %s1111_s9  ;;  %p1187_p1 = scmp.eq.s32.totalorder %s765_s15, 0 }
   0x9   : > { %p1191_p2 = scmp.eq.s32.totalorder %s765_s15, 1  ;;  %p106_p3 = scmp.eq.s32.totalorder %s766_s16, 1 }
   0xa   : > { %p1197_p4 = por %p1187_p1, %p53_p0  ;;  %p767_p5 = scmp.ge.s32.totalorder %s1131_s14, 1 }
   0xb   : > { %p1202_p6 = por %p106_p3, %p53_p0  ;;  %p113_p7 = scmp.lt.s32.totalorder %s1131_s14, 3 }
   0xc   : > { %s1372_s19 = scalar_select %p1197_p4, 1, 0 }
   0xd   : > { %s1373_s20 = scalar_select %p1202_p6, 1, 0 }
   0xe   : > { %p1207_p8 = pnand %p767_p5, %p113_p7  ;;  %s1133_s22 = smov [#allocation5]  }
   0xf   : > { %s125_s23 = sshll.u32 %s1133_s22, 4  ;;  %s31_s25 = sadd.s32 1, %s1127_s13  ;;  %s126_s23 = int_to_ptr.vmem [resolvable:$true] %s125_s23 }
  0x10   : > { %p902_p9 = pneg %p1207_p8  ;;  %s1004_s26 = scalar_lea.vmem %s126_s23, 1024 }
  0x11   : > { %p1005_p13 = scmp.ne.s32.totalorder %s126_s23, %s1004_s26  ;;  %p1012_p5 = scmp.lt.s32.totalorder %s126_s23, %s126_s23 }
  0x12   : > { %p1216_p11 = pnand %p902_p9, %p1187_p1  ;;  %p1013_p7 = scmp.lt.s32.totalorder %s1004_s26, %s1004_s26 }
  0x14   : > { %p995_p12 = pneg %p1216_p11  ;;  %p1014_p6 = por %p1013_p7, %p1012_p5 }
  0x16   : > { %p1007_p0 = pnand %p1005_p13, %p995_p12 }
  0x18   : > { %p1008_p3 = pneg %p1007_p0 }
  0x1a   : > { %p1015_p4 = pnand %p1014_p6, %p1008_p3 }
  0x1c   : > { %1018 = shalt.err (!%p1015_p4)
}
  0x1d   : > { %s1369_s27 = smov 64   ;;  %s1135_s28 = smov 4  }
  0x1e   : > { %905 = dma.hbm_to_vmem [thread:$0]  (!%p1216_p11), %s1366_s1, 1024, %s126_s23, [#allocation6], %s1369_s27, %s1369_s27, %s1135_s28  }
  0x1f   : > { %p33_p4 = scmp.ge.s32.totalorder %s31_s25, 2  ;;  %s40_s3 = sadd.s32 1, %s1119_s11 }
  0x20   : > { %p47_p6 = scmp.ne.s32.totalorder %s1119_s11, %s1115_s10  ;;  %p48_p9 = scmp.eq.s32.totalorder %s1131_s14, 0 }
  0x21   : > { %s1389_s25 = smov (%p33_p4, %s31_s25), 0  ;;  %p915_p0 = scmp.lt.s32.totalorder %s1131_s14, 2 }
  0x22   : > { %p1237_p12 = por %p48_p9, %p47_p6  ;;  %p1243_p13 = por %p1191_p2, %p47_p6 }
  0x23   : > { %s35_s6 = ssub.s32 %s1127_s13, %s1389_s25  ;;  %s139_s7 = sand.u32 1, %s1119_s11  }
  0x24   : > { %p38_p11 = scmp.eq.s32.totalorder %s35_s6, 0  ;;  %s770_s8 = sshll.u32 %s139_s7, 7 }
  0x25   : > { %s805_s16 = sshll.u32 %s1127_s13, 11  ;;  %s143_s26 = scalar_lea.vmem [#allocation2], %s770_s8 }
  0x26   : > { %s1252_s15 = scalar_select %p38_p11, %s1119_s11, %s40_s3  }
  0x27   : > { %s151_s24 = scalar_lea.hbm %s1365_s0, %s805_s16  ;;  %s152_s29 = sshll.u32 %s143_s26, 4  ;;  %s153_s29 = int_to_ptr.vmem [resolvable:$true] %s152_s29 }
  0x28   : > { %p1260_p2 = pnand %p915_p0, %p1237_p12  ;;  %s140_s30 = scalar_lea.sflag [#allocation3], %s139_s7 }
  0x29   : > { %s1032_s6 = scalar_lea.vmem %s153_s29, 2048  ;;  %s1136_s3 = smov [#allocation2]  }
  0x2a   : > { %p1021_p3 = pneg %p1260_p2  ;;  %p1033_p5 = scmp.ne.s32.totalorder %s153_s29, %s1032_s6 }
  0x2b   : > { %s1037_s27 = sshll.u32 %s1136_s3, 4  ;;  %s1038_s27 = int_to_ptr.vmem [resolvable:$false] %s1037_s27 }
  0x2c   : > { %p1035_p7 = pnand %p1033_p5, %p1021_p3  ;;  %s1039_s16 = scalar_lea.vmem %s1038_s27, 4096 }
  0x2d   : > { %p1040_p6 = scmp.lt.s32.totalorder %s153_s29, %s1038_s27  ;;  %p1041_p9 = scmp.lt.s32.totalorder %s1039_s16, %s1032_s6 }
  0x2e   : > { %p1036_p4 = pneg %p1035_p7 }
  0x2f   : > { %p1042_p11 = por %p1041_p9, %p1040_p6 }
  0x31   : > { %p1043_p10 = pnand %p1042_p11, %p1036_p4 }
  0x33   : > { %1046 = shalt.err (!%p1043_p10)
}
  0x34   : > { %s1379_s4 = smov 64   ;;  %164 = sbr.rel (%p1207_p8) target bundleno = 381 (0x17d), region = 28 }
  0x35   : > { %909 = dma.hbm_to_vmem [thread:$0]  (!%p1260_p2), %s151_s24, 2048, %s153_s29, %s140_s30, %s1379_s4, %s1379_s4, %s1135_s28  }
  0x36   : > { %s1274_s7 = sand.u32 (!%p1207_p8), 1, %s1115_s10   ;;  %p1380_p10 = scmp.ne.s32.totalorder (!%p1207_p8), %s1372_s19, 0 }
  0x37   : > { %s774_s27 = sshll.u32 (!%p1207_p8), %s1274_s7, 7  ;;  %s167_s8 = scalar_lea.sflag (!%p1207_p8), [#allocation3], %s1274_s7 }
  0x38   : > { %s1278_s22 = scalar_lea.vmem (!%p1207_p8), [#allocation2], %s774_s27 }
  0x39   : > { %1098 = dma.done.wait (%p1380_p10), %s167_s8, 2048  }
  0x3a   : > { %1100 = vsyncadd (%p1380_p10), %s167_s8, 4294965248 }
  0x3b   : > { %1102 = dma.done.wait (%p1187_p1), [#allocation6], 1024  }
  0x3c   : > { %1104 = vsyncadd (%p1187_p1), [#allocation6], 4294966272  ;;  %v969_v0 = vld [vmem:[#allocation5 + $0x38] sm:$0xff]   ;;  %v970_v1 = vld [vmem:[#allocation5 + $0x30] sm:$0xff]   ;;  %s776_s17 = sshll.u32 %s1274_s7, 1  ;;  %s802_s19 = sshll.u32 %s1123_s12, 5 }
  0x3d   : > { %830 = vmatprep.subr.bf16.mxu0 %v969_v0  ;;  %878 = vmatprep.subr.bf16.mxu1 %v969_v0  ;;  %v971_v2 = vld [vmem:[#allocation5 + $0x28] sm:$0xff]   ;;  %v972_v3 = vld [vmem:[#allocation5 + $0x20] sm:$0xff]   ;;  %v973_v5 = vld [vmem:[#allocation5 + $0x18] sm:$0xff]   ;;  %s194_s21 = scalar_lea.vmem [#allocation7], %s776_s17  ;;  %s671_s26 = scalar_lea.hbm %s1367_s2, %s802_s19 }
  0x3e   : > { %831 = vmatpush3.bf16.msra.mxu0 %v969_v0  ;;  %886 = vmatpush3.bf16.msra.mxu1 %v969_v0  ;;  %v977_v4 = vld [vmem:[%s1278_s22] sm:$0xff]   ;;  %v974_v6 = vld [vmem:[#allocation5 + $0x10] sm:$0xff]   ;;  %v975_v8 = vld [vmem:[#allocation5 + $0x8] sm:$0xff]   ;;  %s673_s28 = sshll.u32 %s194_s21, 4  ;;  %s659_s29 = scalar_lea.sflag [#allocation4], %s1274_s7  ;;  %s674_s28 = int_to_ptr.vmem [resolvable:$true] %s673_s28 }
  0x3f   : > { %832 = vmatprep.subr.bf16.mxu0 %v970_v1  ;;  %879 = vmatprep.subr.bf16.mxu1 %v970_v1  ;;  %v985_v7 = vld [vmem:[%s1278_s22 + $0x40] sm:$0xff]   ;;  %v978_v10 = vld [vmem:[%s1278_s22 + $0x8] sm:$0xff]   ;;  %v979_v12 = vld [vmem:[%s1278_s22 + $0x10] sm:$0xff]   ;;  %s1047_s18 = scalar_lea.vmem %s674_s28, 32  ;;  %s1137_s30 = smov [#allocation7]  }
  0x40   : > { %846 = vmatprep.mubr.bf16.mxu0 %v977_v4  ;;  %862 = vmatprep.mubr.bf16.mxu1 %v985_v7  ;;  %v976_v9 = vld [vmem:[#allocation5] sm:$0xff]   ;;  %v986_v11 = vld [vmem:[%s1278_s22 + $0x48] sm:$0xff]   ;;  %v987_v13 = vld [vmem:[%s1278_s22 + $0x50] sm:$0xff]   ;;  %p1048_p1 = scmp.ne.s32.totalorder %s674_s28, %s1047_s18  ;;  %s1051_s12 = sshll.u32 %s1137_s30, 4  ;;  %s1052_s12 = int_to_ptr.vmem [resolvable:$false] %s1051_s12 }
  0x41   : > { %v980_v14 = vld [vmem:[%s1278_s22 + $0x18] sm:$0xff]   ;;  %v981_v16 = vld [vmem:[%s1278_s22 + $0x20] sm:$0xff]   ;;  %v982_v18 = vld [vmem:[%s1278_s22 + $0x28] sm:$0xff]   ;;  %s1053_s6 = scalar_lea.vmem %s1052_s12, 64  ;;  %p1054_p0 = scmp.lt.s32.totalorder %s674_s28, %s1052_s12 }
  0x42   : > { %833 = vmatpush3.bf16.msra.mxu0 %v970_v1  ;;  %887 = vmatpush3.bf16.msra.mxu1 %v970_v1  ;;  %v988_v15 = vld [vmem:[%s1278_s22 + $0x58] sm:$0xff]   ;;  %v989_v17 = vld [vmem:[%s1278_s22 + $0x60] sm:$0xff]   ;;  %v990_v19 = vld [vmem:[%s1278_s22 + $0x68] sm:$0xff]   ;;  %p1049_p8 = pnand %p1048_p1, %p1243_p13  ;;  %p1055_p2 = scmp.lt.s32.totalorder %s1053_s6, %s1047_s18 }
  0x43   : > { %834 = vmatprep.subr.bf16.mxu0 %v971_v2  ;;  %880 = vmatprep.subr.bf16.mxu1 %v971_v2  ;;  %v983_v20 = vld [vmem:[%s1278_s22 + $0x30] sm:$0xff]   ;;  %v984_v22 = vld [vmem:[%s1278_s22 + $0x38] sm:$0xff]  }
  0x44   : > { %v991_v21 = vld [vmem:[%s1278_s22 + $0x70] sm:$0xff]   ;;  %v992_v23 = vld [vmem:[%s1278_s22 + $0x78] sm:$0xff]   ;;  %p1050_p12 = pneg %p1049_p8  ;;  %p1056_p3 = por %p1055_p2, %p1054_p0 }
  0x46   : > { %835 = vmatpush3.bf16.msra.mxu0 %v971_v2  ;;  %888 = vmatpush3.bf16.msra.mxu1 %v971_v2  ;;  %p1057_p5 = pnand %p1056_p3, %p1050_p12 }
  0x47   : > { %836 = vmatprep.subr.bf16.mxu0 %v972_v3  ;;  %881 = vmatprep.subr.bf16.mxu1 %v972_v3 }
  0x4a   : > { %837 = vmatpush3.bf16.msra.mxu0 %v972_v3  ;;  %889 = vmatpush3.bf16.msra.mxu1 %v972_v3 }
  0x4b   : > { %838 = vmatprep.subr.bf16.mxu0 %v973_v5  ;;  %882 = vmatprep.subr.bf16.mxu1 %v973_v5 }
  0x4e   : > { %839 = vmatpush3.bf16.msra.mxu0 %v973_v5  ;;  %890 = vmatpush3.bf16.msra.mxu1 %v973_v5 }
  0x4f   : > { %840 = vmatprep.subr.bf16.mxu0 %v974_v6  ;;  %883 = vmatprep.subr.bf16.mxu1 %v974_v6 }
  0x52   : > { %841 = vmatpush3.bf16.msra.mxu0 %v974_v6  ;;  %891 = vmatpush3.bf16.msra.mxu1 %v974_v6 }
  0x53   : > { %842 = vmatprep.subr.bf16.mxu0 %v975_v8  ;;  %884 = vmatprep.subr.bf16.mxu1 %v975_v8 }
  0x56   : > { %843 = vmatpush3.bf16.msra.mxu0 %v975_v8  ;;  %892 = vmatpush3.bf16.msra.mxu1 %v975_v8 }
  0x57   : > { %844 = vmatprep.subr.bf16.mxu0 %v976_v9  ;;  %885 = vmatprep.subr.bf16.mxu1 %v976_v9 }
  0x5a   : > { %845 = vmatpush3.bf16.msra.mxu0 %v976_v9  ;;  %893 = vmatpush3.bf16.msra.mxu1 %v976_v9 }
  0x5d   : > { %847 = vmatmul.mubr.bf16.vlgmr.msra.gmra.mxu0 %v978_v10  ;;  %863 = vmatmul.mubr.bf16.vlgmr.msra.gmra.mxu1 %v986_v11 }
  0x5e   : > { %850 = vmatprep.mubr.bf16.mxu0 %v979_v12  ;;  %866 = vmatprep.mubr.bf16.mxu1 %v987_v13 }
  0x65   : > { %851 = vmatmul.mubr.bf16.gmra.mxu0 %v980_v14  ;;  %867 = vmatmul.mubr.bf16.gmra.mxu1 %v988_v15 }
  0x66   : > { %854 = vmatprep.mubr.bf16.mxu0 %v981_v16  ;;  %870 = vmatprep.mubr.bf16.mxu1 %v989_v17 }
  0x6d   : > { %855 = vmatmul.mubr.bf16.gmra.mxu0 %v982_v18  ;;  %871 = vmatmul.mubr.bf16.gmra.mxu1 %v990_v19 }
  0x6e   : > { %858 = vmatprep.mubr.bf16.mxu0 %v983_v20  ;;  %874 = vmatprep.mubr.bf16.mxu1 %v991_v21 }
  0x75   : > { %859 = vmatmul.mubr.bf16.gmra.mxu0 %v984_v22  ;;  %875 = vmatmul.mubr.bf16.gmra.mxu1 %v992_v23 }
 0x11d   : > { %v848_v24 = vpop.f32.mrf.mxu0  ;;  %v1304_v25 = vpop.f32.mrf.mxu1 }
 0x11e   : > { %v590_v35 = vmul.f32 %v848_v24, %v848_v24 }
 0x11f   : > { %v423_v26 = vpop.f32.mrf.mxu0  ;;  %v1306_v28 = vpop.f32.mrf.mxu1 }
 0x120   : > { %v588_v30 = vmul.f32 %v423_v26, %v423_v26 }
 0x121   : > { %v849_v27 = vpop.f32.mrf.mxu0  ;;  %v1308_v34 = vpop.f32.mrf.mxu1 }
 0x122   : > { %v591_v39 = vmul.f32 %v849_v27, %v849_v27 }
 0x123   : > { %v426_v29 = vpop.f32.mrf.mxu0  ;;  %v490_v43 = vpop.f32.mrf.mxu1 }
 0x124   : > { %v550_v31 = vadd.f32 %v426_v29, %v423_v26  ;;  %v589_v32 = vmul.f32 %v426_v29, %v426_v29 }
 0x125   : > { %v852_v33 = vpop.f32.mrf.mxu0  ;;  %v1310_v52 = vpop.f32.mrf.mxu1 }
 0x126   : > { %v551_v36 = vadd.f32 %v848_v24, %v550_v31  ;;  %v620_v37 = vadd.f32 %v589_v32, %v588_v30  ;;  %v594_v53 = vmul.f32 %v852_v33, %v852_v33 }
 0x127   : > { %v439_v38 = vpop.f32.mrf.mxu0  ;;  %v503_v61 = vpop.f32.mrf.mxu1 }
 0x128   : > { %v621_v40 = vadd.f32 %v620_v37, %v590_v35  ;;  %v552_v41 = vadd.f32 %v849_v27, %v551_v36  ;;  %v592_v45 = vmul.f32 %v439_v38, %v439_v38 }
 0x129   : > { %v853_v42 = vpop.f32.mrf.mxu0  ;;  %v869_v6 = vpop.f32.mrf.mxu1 }
 0x12a   : > { %v553_v44 = vadd.f32 %v552_v41, %v439_v38  ;;  %v622_v46 = vadd.f32 %v621_v40, %v591_v39  ;;  %v595_v57 = vmul.f32 %v853_v42, %v853_v42  ;;  %v605_v38 = vmul.f32 %v490_v43, %v490_v43 }
 0x12b   : > { %v442_v47 = vpop.f32.mrf.mxu0  ;;  %v506_v15 = vpop.f32.mrf.mxu1  ;;  %v606_v41 = vmul.f32 %v1304_v25, %v1304_v25 }
 0x12c   : > { %v623_v48 = vadd.f32 %v622_v46, %v592_v45  ;;  %v554_v49 = vadd.f32 %v553_v44, %v442_v47  ;;  %v593_v50 = vmul.f32 %v442_v47, %v442_v47  ;;  %v607_v45 = vmul.f32 %v1308_v34, %v1308_v34 }
 0x12d   : > { %v856_v51 = vpop.f32.mrf.mxu0  ;;  %v872_v23 = vpop.f32.mrf.mxu1 }
 0x12e   : > { %v555_v54 = vadd.f32 %v852_v33, %v554_v49  ;;  %v624_v55 = vadd.f32 %v623_v48, %v593_v50  ;;  %v598_v7 = vmul.f32 %v856_v51, %v856_v51  ;;  %v604_v33 = vmul.f32 %v1306_v28, %v1306_v28 }
 0x12f   : > { %v455_v56 = vpop.f32.mrf.mxu0  ;;  %v519_v32 = vpop.f32.mrf.mxu1  ;;  %v608_v50 = vmul.f32 %v503_v61, %v503_v61 }
 0x130   : > { %v625_v58 = vadd.f32 %v624_v55, %v594_v53  ;;  %v556_v59 = vadd.f32 %v853_v42, %v555_v54  ;;  %v596_v63 = vmul.f32 %v455_v56, %v455_v56  ;;  %v609_v53 = vmul.f32 %v506_v15, %v506_v15 }
 0x131   : > { %v857_v60 = vpop.f32.mrf.mxu0  ;;  %v873_v40 = vpop.f32.mrf.mxu1  ;;  %v610_v55 = vmul.f32 %v1310_v52, %v1310_v52 }
 0x132   : > { %v557_v62 = vadd.f32 %v556_v59, %v455_v56  ;;  %v626_v0 = vadd.f32 %v625_v58, %v595_v57  ;;  %v599_v11 = vmul.f32 %v857_v60, %v857_v60  ;;  %v611_v57 = vmul.f32 %v869_v6, %v869_v6 }
 0x133   : > { %v458_v1 = vpop.f32.mrf.mxu0  ;;  %v522_v48 = vpop.f32.mrf.mxu1 }
 0x134   : > { %v627_v2 = vadd.f32 %v626_v0, %v596_v63  ;;  %v558_v3 = vadd.f32 %v557_v62, %v458_v1  ;;  %v597_v4 = vmul.f32 %v458_v1, %v458_v1  ;;  %v613_v1 = vmul.f32 %v522_v48, %v522_v48 }
 0x135   : > { %v860_v5 = vpop.f32.mrf.mxu0  ;;  %v876_v54 = vpop.f32.mrf.mxu1 }
 0x136   : > { %v559_v8 = vadd.f32 %v856_v51, %v558_v3  ;;  %v628_v9 = vadd.f32 %v627_v2, %v597_v4  ;;  %v602_v24 = vmul.f32 %v860_v5, %v860_v5  ;;  %v614_v3 = vmul.f32 %v872_v23, %v872_v23 }
 0x137   : > { %v471_v10 = vpop.f32.mrf.mxu0 }
 0x138   : > { %v629_v12 = vadd.f32 %v628_v9, %v598_v7  ;;  %v560_v13 = vadd.f32 %v857_v60, %v559_v8  ;;  %v600_v17 = vmul.f32 %v471_v10, %v471_v10  ;;  %v535_v60 = vpop.f32.mrf.mxu1  ;;  %v615_v7 = vmul.f32 %v873_v40, %v873_v40 }
 0x139   : > { %v861_v14 = vpop.f32.mrf.mxu0 }
 0x13a   : > { %v561_v16 = vadd.f32 %v560_v13, %v471_v10  ;;  %v630_v18 = vadd.f32 %v629_v12, %v599_v11  ;;  %v603_v29 = vmul.f32 %v861_v14, %v861_v14  ;;  %v877_v2 = vpop.f32.mrf.mxu1  ;;  %v616_v11 = vmul.f32 %v535_v60, %v535_v60 }
 0x13b   : > { %v474_v19 = vpop.f32.mrf.mxu0 }
 0x13c   : > { %v631_v20 = vadd.f32 %v630_v18, %v600_v17  ;;  %v562_v21 = vadd.f32 %v561_v16, %v474_v19  ;;  %v601_v22 = vmul.f32 %v474_v19, %v474_v19  ;;  %v538_v10 = vpop.f32.mrf.mxu1  ;;  %v619_v18 = vmul.f32 %v877_v2, %v877_v2 }
 0x13e   : > { %v563_v26 = vadd.f32 %v860_v5, %v562_v21  ;;  %v632_v27 = vadd.f32 %v631_v20, %v601_v22 }
 0x140   : > { %v564_v30 = vadd.f32 %v861_v14, %v563_v26  ;;  %v633_v31 = vadd.f32 %v632_v27, %v602_v24  ;;  %v617_v14 = vmul.f32 %v538_v10, %v538_v10 }
 0x142   : > { %v634_v35 = vadd.f32 %v633_v31, %v603_v29  ;;  %v565_v36 = vadd.f32 %v564_v30, %v1306_v28 }
 0x144   : > { %v566_v37 = vadd.f32 %v565_v36, %v490_v43  ;;  %v635_v39 = vadd.f32 %v634_v35, %v604_v33 }
 0x146   : > { %v567_v42 = vadd.f32 %v1304_v25, %v566_v37  ;;  %v636_v44 = vadd.f32 %v635_v39, %v605_v38 }
 0x148   : > { %v637_v46 = vadd.f32 %v636_v44, %v606_v41  ;;  %v568_v47 = vadd.f32 %v1308_v34, %v567_v42  ;;  %v612_v34 = vmul.f32 %v519_v32, %v519_v32 }
 0x14a   : > { %v569_v49 = vadd.f32 %v568_v47, %v503_v61  ;;  %v638_v28 = vadd.f32 %v637_v46, %v607_v45 }
 0x14c   : > { %v639_v51 = vadd.f32 %v638_v28, %v608_v50  ;;  %v570_v43 = vadd.f32 %v569_v49, %v506_v15  ;;  %v618_v15 = vmul.f32 %v876_v54, %v876_v54 }
 0x14e   : > { %v571_v25 = vadd.f32 %v1310_v52, %v570_v43  ;;  %v640_v56 = vadd.f32 %v639_v51, %v609_v53 }
 0x150   : > { %v641_v58 = vadd.f32 %v640_v56, %v610_v55  ;;  %v572_v59 = vadd.f32 %v869_v6, %v571_v25 }
 0x152   : > { %v573_v62 = vadd.f32 %v572_v59, %v519_v32  ;;  %v642_v63 = vadd.f32 %v641_v58, %v611_v57 }
 0x154   : > { %v643_v0 = vadd.f32 %v642_v63, %v612_v34  ;;  %v574_v61 = vadd.f32 %v573_v62, %v522_v48 }
 0x156   : > { %v575_v4 = vadd.f32 %v872_v23, %v574_v61  ;;  %v644_v5 = vadd.f32 %v643_v0, %v613_v1 }
 0x158   : > { %v645_v8 = vadd.f32 %v644_v5, %v614_v3  ;;  %v576_v9 = vadd.f32 %v873_v40, %v575_v4 }
 0x15a   : > { %v577_v52 = vadd.f32 %v576_v9, %v535_v60  ;;  %v646_v12 = vadd.f32 %v645_v8, %v615_v7 }
 0x15c   : > { %v647_v6 = vadd.f32 %v646_v12, %v616_v11  ;;  %v578_v13 = vadd.f32 %v577_v52, %v538_v10 }
 0x15e   : > { %v579_v16 = vadd.f32 %v876_v54, %v578_v13  ;;  %v648_v17 = vadd.f32 %v647_v6, %v617_v14 }
 0x160   : > { %v580_v19 = vadd.f32 %v877_v2, %v579_v16  ;;  %v649_v20 = vadd.f32 %v648_v17, %v618_v15 }
 0x162   : > { %v581_v21 = vrot.slane %v580_v19, 4  ;;  %v650_v22 = vadd.f32 %v649_v20, %v619_v18 }
 0x164   : > { %v582_v23 = vadd.f32 %v581_v21, %v580_v19  ;;  %v651_v24 = vrot.slane %v650_v22, 4 }
 0x166   : > { %v583_v26 = vrot.slane %v582_v23, 2  ;;  %v652_v27 = vadd.f32 %v651_v24, %v650_v22 }
 0x168   : > { %v584_v29 = vadd.f32 %v583_v26, %v582_v23  ;;  %v653_v30 = vrot.slane %v652_v27, 2 }
 0x16a   : > { %v585_v31 = vrot.slane %v584_v29, 1  ;;  %v654_v32 = vadd.f32 %v653_v30, %v652_v27 }
 0x16c   : > { %v586_v33 = vadd.f32 %v585_v31, %v584_v29  ;;  %v655_v35 = vrot.slane %v654_v32, 1 }
 0x16e   : > { %v656_v36 = vadd.f32 %v655_v35, %v654_v32  ;;  %587 = vst [vmem:[%s194_s21] sm:$0x1] %v586_v33 }
 0x170   : > { %657 = vst [vmem:[%s194_s21 + $0x1] sm:$0x1] %v656_v36 }
 0x171   : > { %1060 = shalt.err (!%p1057_p5)
}
 0x172   : > { %s1061_s3 = scalar_lea.hbm %s671_s26, 32  ;;  %s1065_s7 = scalar_lea.hbm %s1367_s2, 64 }
 0x173   : > { %p1062_p7 = scmp.ne.s32.totalorder %s671_s26, %s1061_s3  ;;  %p1066_p9 = scmp.lt.s32.totalorder %s671_s26, %s1367_s2 }
 0x174   : > { %p1067_p11 = scmp.lt.s32.totalorder %s1065_s7, %s1061_s3 }
 0x175   : > { %p1063_p4 = pnand %p1062_p7, %p1243_p13 }
 0x176   : > { %p1068_p10 = por %p1067_p11, %p1066_p9 }
 0x177   : > { %p1064_p6 = pneg %p1063_p4 }
 0x179   : > { %p1069_p1 = pnand %p1068_p10, %p1064_p6 }
 0x17b   : > { %1072 = shalt.err (!%p1069_p1)
}
 0x17c   : > { %900 = dma.vmem_to_hbm [thread:$0]  (%p1243_p13), %s674_s28, 32, %s671_s26, %s659_s29  }
 0x17d PF: > { %s685_s22 = sand.u32 1, %s1111_s9   ;;  %p1381_p8 = scmp.ne.s32.totalorder %s1373_s20, 0 }
 0x17e   : > { %p1382_p12 = scmp.ge.s32.totalorder %s1131_s14, 2  ;;  %s686_s17 = scalar_lea.sflag [#allocation4], %s685_s22 }
 0x180   : > { %p911_p0 = pnand %p1382_p12, %p1381_p8 }
 0x182   : > { %p912_p2 = pneg %p911_p0 }
 0x184   : > { %1106 = dma.done.wait (%p912_p2), %s686_s17, 32  }
 0x185   : > { %1108 = vsyncadd (%p912_p2), %s686_s17, 4294967264  ;;  %s19_s14 = sadd.s32 1, %s1131_s14   ;;  %s1383_s9 = smov %s1115_s10 }
 0x186   : > { %p16_p3 = scmp.ge.s32.totalorder %s19_s14, 4   ;;  %s1384_s10 = smov %s1119_s11 }
 0x187   : > { %s1385_s11 = smov %s1252_s15  ;;  %s1386_s12 = smov %s1127_s13 }
 0x188   : > { %s1387_s13 = smov %s1389_s25  ;;  %18 = sbr.rel (!%p16_p3) target bundleno = 7 (0x7), region = 77 }
 0x18d   :  { %691 = vsyncpa [#allocation3], 1 }
 0x18e   :  { %693 = vsyncpa [#allocation3 + $0x1], 1 }
 0x18f   :  { %694 = vsyncpa [#allocation6], 1 }
 0x190   :  { %695 = vsyncpa [#allocation4], 1 }
 0x191   :  { %697 = vsyncpa [#allocation4 + $0x1], 1 }

</bundles_post_ra>
